<compile_context>
chip_gen: v7x
topology: tpu7x:2x2x1
jax: 0.10.0
libtpu: 0.0.40
codegen_flags: <defaults>
</compile_context>

<pallas_src>
import math

import jax
import jax.numpy as jnp
from jax.experimental import pallas as pl
from jax.experimental.pallas import tpu as pltpu


def _round_up(x: int, m: int) -> int:
    return ((x + m - 1) // m) * m


def _vmem_capacity_bytes() -> int:
    try:
        return int(pltpu.get_tpu_info().vmem_capacity_bytes)
    except Exception:
        return 64 * 1024 * 1024  # conservative default (v7x per-TC VMEM)


def _spec(shape, index_map, mode=None):
    """BlockSpec helper; pipeline_mode only when requested (with fallback)."""
    if mode is None:
        return pl.BlockSpec(shape, index_map)
    try:
        return pl.BlockSpec(shape, index_map, pipeline_mode=mode)
    except TypeError:  # older JAX without pipeline_mode kwarg
        return pl.BlockSpec(shape, index_map)


def gated_fusion_kernel(g_ref, c_ref, w1_ref, w2_ref, b_ref, o_ref):
    j = pl.program_id(1)
    tn = o_ref.shape[1]

    # MXU operands in the prepped weight dtype (bf16 weights => bf16 matmul),
    # f32 accumulation.
    mxu_dtype = w1_ref.dtype
    g = g_ref[...].astype(mxu_dtype)
    c = c_ref[...].astype(mxu_dtype)

    # gate pre-activation:  cat([g, c]) @ W.T + b  ==  g @ W1.T + c @ W2.T + b
    z = (
        jnp.dot(g, w1_ref[...], preferred_element_type=jnp.float32)
        + jnp.dot(c, w2_ref[...], preferred_element_type=jnp.float32)
        + b_ref[...]  # bias is stored f32
    )
    gate = jax.nn.sigmoid(z)  # EUP logistic path

    # Blend only this N-tile's columns:  gate*g + (1-gate)*c == c + gate*(g-c)
    off = pl.multiple_of(j * tn, 128)
    g_n = g_ref[:, pl.ds(off, tn)]
    c_n = c_ref[:, pl.ds(off, tn)]
    if o_ref.dtype == jnp.bfloat16:
        # bf16 blend: native bf16 VPU on v6e/v7x, no full-tile f32 casts.
        gate_o = gate.astype(jnp.bfloat16)
        o_ref[...] = (c_n + gate_o * (g_n - c_n)).astype(o_ref.dtype)
    else:
        g32 = g_n.astype(jnp.float32)
        c32 = c_n.astype(jnp.float32)
        o_ref[...] = (c32 + gate * (g32 - c32)).astype(o_ref.dtype)


def prep_gated_fusion_params(weight, bias, *, param_dtype=None):
    """One-time parameter prep (hoisted out of the per-call path).

    weight: (H, 2H), bias: (H,).  param_dtype is the dtype fed to the MXU —
    pass jnp.bfloat16 on v5e (no f32 MXU path) and/or to halve resident-weight
    VMEM; defaults to weight.dtype.
    """
    H = weight.shape[0]
    assert weight.shape == (H, 2 * H), "weight must be (H, 2H)"
    if param_dtype is None:
        param_dtype = weight.dtype
    Hp = max(128, _round_up(H, 128))

    w1_t = weight[:, :H].T.astype(param_dtype)  # (H, H), multiplies gpt_embed
    w2_t = weight[:, H:].T.astype(param_dtype)  # (H, H), multiplies conf_embed
    b2 = bias.astype(jnp.float32).reshape(1, H)
    if Hp != H:
        p = Hp - H
        w1_t = jnp.pad(w1_t, ((0, p), (0, p)))
        w2_t = jnp.pad(w2_t, ((0, p), (0, p)))
        b2 = jnp.pad(b2, ((0, 0), (0, p)))
    return w1_t, w2_t, b2


def gated_fusion(gpt_embed, conf_embed, params, *, tile_m=512, tile_n=512):
    """gpt_embed, conf_embed: (..., H); params = prep_gated_fusion_params(...)."""
    w1_t, w2_t, b2 = params
    orig_shape = gpt_embed.shape
    H = orig_shape[-1]
    Hp = w1_t.shape[0]
    out_dtype = gpt_embed.dtype

    g2 = gpt_embed.reshape(-1, H)
    c2 = conf_embed.reshape(-1, H)
    M = g2.shape[0]

    # Lane-dense feature padding (only when H is not a multiple of 128).
    # Zero feature columns hit zero weight rows, so the math is unchanged.
    if Hp != H:
        g2 = jnp.pad(g2, ((0, 0), (0, Hp - H)))
        c2 = jnp.pad(c2, ((0, 0), (0, Hp - H)))

    in_isz = jnp.dtype(out_dtype).itemsize
    w_isz = jnp.dtype(w1_t.dtype).itemsize

    # ---- generation-aware VMEM budget --------------------------------------
    cap = _vmem_capacity_bytes()          # ~128 MiB v5e/v6e, ~64 MiB v7x/TC
    vmem_budget = (cap * 5) // 8          # ~80 MiB / ~40 MiB
    vmem_limit = (cap * 7) // 8           # ~112 MiB / ~56 MiB headroom

    # ---- weight residency vs N-tiling ---------------------------------------
    resident_w_bytes = 2 * Hp * Hp * w_isz        # W1^T + W2^T, single-buffered
    if resident_w_bytes <= vmem_budget // 2:
        TN = Hp
        w_mode = pl.Buffered(1)                   # constant index_map -> 1 buf
        w_buf_bytes = resident_w_bytes + Hp * 4   # + f32 bias
    else:
        # Stream weights along an N axis (avoids the 2*Hp^2 residency cliff,
        # e.g. H >= 4096 bf16 on v7x).  TN must divide Hp (both mult. of 128).
        TN = 128
        start = (min(tile_n, Hp) // 128) * 128
        for cand in range(start, 127, -128):
            if Hp % cand == 0:
                TN = cand
                break
        w_mode = None                             # default double-buffering
        w_buf_bytes = 2 * 2 * Hp * TN * w_isz + 2 * TN * 4

    # ---- pick TM: streamed g/c/out (double-buffered) + f32 epilogue temps ---
    bytes_per_row = (4 * Hp + 2 * TN) * in_isz + 4 * TN * 4
    stream_budget = max(vmem_budget - w_buf_bytes, 2 * 1024 * 1024)
    max_tm = max(8, (stream_budget // bytes_per_row) // 8 * 8)
    TM = max(8, min(tile_m, max_tm, _round_up(M, 8)))
    if M > TM:
        # Ensure >= 2 balanced M tiles so both v7x TensorCores get work.
        TM = max(8, min(TM, _round_up(pl.cdiv(M, 2), 8)))

    m_tiles = pl.cdiv(M, TM)   # no jnp.pad of M: Pallas masks the boundary
    n_tiles = pl.cdiv(Hp, TN)  # block (junk rows stay finite, never stored)

    out = pl.pallas_call(
        gated_fusion_kernel,
        out_shape=jax.ShapeDtypeStruct((M, Hp), out_dtype),
        grid_spec=pltpu.PrefetchScalarGridSpec(
            num_scalar_prefetch=0,
            grid=(m_tiles, n_tiles),
            in_specs=[
                pl.BlockSpec((TM, Hp), lambda i, j: (i, 0)),   # gpt rows (streamed, j-invariant)
                pl.BlockSpec((TM, Hp), lambda i, j: (i, 0)),   # conf rows (streamed, j-invariant)
                _spec((Hp, TN), lambda i, j: (0, j), w_mode),  # W1^T
                _spec((Hp, TN), lambda i, j: (0, j), w_mode),  # W2^T
                _spec((1, TN), lambda i, j: (0, j), w_mode),   # bias (f32)
            ],
            out_specs=pl.BlockSpec((TM, TN), lambda i, j: (i, j)),
        ),
        compiler_params=pltpu.CompilerParams(
            dimension_semantics=("parallel", "arbitrary"),
            vmem_limit_bytes=int(vmem_limit),
        ),
    )(g2, c2, w1_t, w2_t, b2)

    if Hp != H:
        out = out[:, :H]
    return out.reshape(orig_shape)


def init_gated_fusion_params(key, hidden_size, dtype=jnp.float32):
    """nn.Linear(hidden*2, hidden) default init: U(-1/sqrt(fan_in), 1/sqrt(fan_in))."""
    fan_in = hidden_size * 2
    bound = 1.0 / math.sqrt(fan_in)
    kw, kb = jax.random.split(key)
    weight = jax.random.uniform(kw, (hidden_size, fan_in), dtype, -bound, bound)
    bias = jax.random.uniform(kb, (hidden_size,), dtype, -bound, bound)
    return weight, bias


if __name__ == "__main__":
    B, S, H = 2, 8, 32
    key = jax.random.PRNGKey(0)
    k_g, k_c, k_p = jax.random.split(key, 3)

    gpt_embed = jax.random.normal(k_g, (B, S, H), jnp.float32)
    conf_embed = jax.random.normal(k_c, (B, S, H), jnp.float32)
    weight, bias = init_gated_fusion_params(k_p, H)

    # One-time parameter prep (split/transpose/pad hoisted out of the call).
    # TODO(synk): pass param_dtype=jnp.bfloat16 here on v5e (no f32 MXU path).
    params = prep_gated_fusion_params(weight, bias)

    out = gated_fusion(gpt_embed, conf_embed, params)
    out = jax.block_until_ready(out)

    # Pure-JAX reference.  Tolerance accounts for the TPU MXU's default
    # (bf16-pass) matmul precision on f32 inputs.
    cat = jnp.concatenate([gpt_embed, conf_embed], axis=-1)
    gate = jax.nn.sigmoid(cat @ weight.T + bias)
    ref = gate * gpt_embed + (1.0 - gate) * conf_embed
    assert out.shape == ref.shape
    assert jnp.allclose(out, ref, atol=1e-2, rtol=1e-2), float(
        jnp.max(jnp.abs(out - ref))
    )

    print("KERNEL_OK")
</pallas_src>

<mosaic_0001>
module attributes {stable_mosaic.version = 11 : i64} {
  func.func @gated_fusion_kernel(%arg0: i32, %arg1: i32, %arg2: memref<16x128xf32, #tpu.memory_space<vmem>>, %arg3: memref<16x128xf32, #tpu.memory_space<vmem>>, %arg4: memref<128x128xf32, #tpu.memory_space<vmem>>, %arg5: memref<128x128xf32, #tpu.memory_space<vmem>>, %arg6: memref<1x128xf32, #tpu.memory_space<vmem>>, %arg7: memref<16x128xf32, #tpu.memory_space<vmem>>) attributes {dimension_semantics = [#tpu.dimension_semantics<parallel>, #tpu.dimension_semantics<arbitrary>], iteration_bounds = array<i64: 1, 1>, scalar_prefetch = 0 : i64, scratch_operands = 0 : i64, tpu.core_type = #tpu.core_type<tc>, window_params = [{transform_indices = @transform_0, window_bounds = array<i64: 16, 128>}, {transform_indices = @transform_1, window_bounds = array<i64: 16, 128>}, {pipeline_mode = #tpu.pipeline_mode<synchronous>, transform_indices = @transform_2, window_bounds = array<i64: 128, 128>}, {pipeline_mode = #tpu.pipeline_mode<synchronous>, transform_indices = @transform_3, window_bounds = array<i64: 128, 128>}, {pipeline_mode = #tpu.pipeline_mode<synchronous>, transform_indices = @transform_4, window_bounds = array<i64: 1, 128>}, {transform_indices = @transform_5, window_bounds = array<i64: 16, 128>}]} {
    %c0 = arith.constant 0 : index
    %c0_0 = arith.constant 0 : index
    %0 = vector.load %arg2[%c0, %c0_0] : memref<16x128xf32, #tpu.memory_space<vmem>>, vector<16x128xf32>
    %c0_1 = arith.constant 0 : index
    %c0_2 = arith.constant 0 : index
    %1 = vector.load %arg3[%c0_1, %c0_2] : memref<16x128xf32, #tpu.memory_space<vmem>>, vector<16x128xf32>
    %c0_3 = arith.constant 0 : index
    %c0_4 = arith.constant 0 : index
    %2 = vector.load %arg4[%c0_3, %c0_4] : memref<128x128xf32, #tpu.memory_space<vmem>>, vector<128x128xf32>
    %cst = arith.constant dense<0.000000e+00> : vector<16x128xf32>
    %3 = tpu.matmul %0, %2, %cst {dimension_numbers = #tpu.dot_dimension_numbers<[1], [0], [0], [1], [0, 0, 1, 1], [], []>} : vector<16x128xf32>, vector<128x128xf32>, vector<16x128xf32> -> vector<16x128xf32>
    %c0_5 = arith.constant 0 : index
    %c0_6 = arith.constant 0 : index
    %4 = vector.load %arg5[%c0_5, %c0_6] : memref<128x128xf32, #tpu.memory_space<vmem>>, vector<128x128xf32>
    %cst_7 = arith.constant dense<0.000000e+00> : vector<16x128xf32>
    %5 = tpu.matmul %1, %4, %cst_7 {dimension_numbers = #tpu.dot_dimension_numbers<[1], [0], [0], [1], [0, 0, 1, 1], [], []>} : vector<16x128xf32>, vector<128x128xf32>, vector<16x128xf32> -> vector<16x128xf32>
    %6 = arith.addf %3, %5 : vector<16x128xf32>
    %c0_8 = arith.constant 0 : index
    %c0_9 = arith.constant 0 : index
    %7 = vector.load %arg6[%c0_8, %c0_9] : memref<1x128xf32, #tpu.memory_space<vmem>>, vector<1x128xf32>
    %8 = vector.broadcast %7 : vector<1x128xf32> to vector<16x128xf32>
    %9 = arith.addf %6, %8 : vector<16x128xf32>
    %10 = arith.negf %9 : vector<16x128xf32>
    %11 = math.exp %10 : vector<16x128xf32>
    %cst_10 = arith.constant 1.000000e+00 : f32
    %12 = vector.broadcast %cst_10 : f32 to vector<16x128xf32>
    %13 = arith.addf %12, %11 : vector<16x128xf32>
    %14 = arith.divf %12, %13 : vector<16x128xf32>
    %c128_i32 = arith.constant 128 : i32
    %15 = arith.muli %arg1, %c128_i32 : i32
    %16 = tpu.assume_multiple %15, 128 : i32
    %c0_11 = arith.constant 0 : index
    %17 = arith.index_cast %16 : i32 to index
    %18 = vector.load %arg2[%c0_11, %17] : memref<16x128xf32, #tpu.memory_space<vmem>>, vector<16x128xf32>
    %c0_12 = arith.constant 0 : index
    %19 = arith.index_cast %16 : i32 to index
    %20 = vector.load %arg3[%c0_12, %19] : memref<16x128xf32, #tpu.memory_space<vmem>>, vector<16x128xf32>
    %21 = arith.subf %18, %20 : vector<16x128xf32>
    %22 = arith.mulf %14, %21 : vector<16x128xf32>
    %23 = arith.addf %20, %22 : vector<16x128xf32>
    %c0_13 = arith.constant 0 : index
    %c0_14 = arith.constant 0 : index
    %24 = vector.load %arg7[%c0_13, %c0_14] : memref<16x128xf32, #tpu.memory_space<vmem>>, vector<16x128xf32>
    tpu.vector_store %arg7[%c0_13, %c0_14], %23 {strides = array<i32>} : memref<16x128xf32, #tpu.memory_space<vmem>>, vector<16x128xf32>,
    return
  }
  func.func @transform_0(%arg0: i32, %arg1: i32) -> (i32, i32) {
    %c0_i32 = arith.constant 0 : i32
    %c0_i32_0 = arith.constant 0 : i32
    return %arg0, %c0_i32 : i32, i32
  }
  func.func @transform_1(%arg0: i32, %arg1: i32) -> (i32, i32) {
    %c0_i32 = arith.constant 0 : i32
    %c0_i32_0 = arith.constant 0 : i32
    return %arg0, %c0_i32 : i32, i32
  }
  func.func @transform_2(%arg0: i32, %arg1: i32) -> (i32, i32) {
    %c0_i32 = arith.constant 0 : i32
    %c0_i32_0 = arith.constant 0 : i32
    return %c0_i32, %arg1 : i32, i32
  }
  func.func @transform_3(%arg0: i32, %arg1: i32) -> (i32, i32) {
    %c0_i32 = arith.constant 0 : i32
    %c0_i32_0 = arith.constant 0 : i32
    return %c0_i32, %arg1 : i32, i32
  }
  func.func @transform_4(%arg0: i32, %arg1: i32) -> (i32, i32) {
    %c0_i32 = arith.constant 0 : i32
    %c0_i32_0 = arith.constant 0 : i32
    return %c0_i32, %arg1 : i32, i32
  }
  func.func @transform_5(%arg0: i32, %arg1: i32) -> (i32, i32) {
    %c0_i32 = arith.constant 0 : i32
    return %arg0, %arg1 : i32, i32
  }
}

</mosaic_0001>

<bundles_post_ra>
// kernel: tpu_custom_call.1
= control target key start
LH: loop header
LB: loop body
LE: loop exit
PB: predicated region body
PF: predicated region fallthrough
CT: control target
= control target key end

     0   :  { %10 = vsyncpa [#allocation3], 0  ;;  %s767_s0 = inlined_call_operand.hbm [shape: f32[16,128], index: 0, kind: input, shape index: {}]   ;;  %s768_s1 = inlined_call_operand.hbm [shape: f32[16,128], index: 1, kind: input, shape index: {}]   ;;  %s769_s2 = inlined_call_operand.hbm [shape: f32[128,128], index: 2, kind: input, shape index: {}]   ;;  %s770_s3 = inlined_call_operand.hbm [shape: f32[128,128], index: 3, kind: input, shape index: {}]   ;;  %s771_s4 = inlined_call_operand.vmem [shape: f32[1,128], index: 4, kind: input, shape index: {}]   ;;  %s772_s5 = inlined_call_operand.hbm [shape: f32[16,128], index: 5, kind: output, shape index: {}]  }
   0x1   :  { %11 = vsyncpa [#allocation6], 0 }
   0x2   :  { %12 = vsyncpa [#allocation9], 0 }
   0x3   :  { %13 = vsyncpa [#allocation4], 0  ;;  %s629_s18 = smov [#allocation5]   ;;  %s630_s20 = smov [#allocation2]  }
   0x4   :  { %s31_s19 = sshll.u32 %s629_s18, 4  ;;  %s19_s21 = sshll.u32 %s630_s20, 4  ;;  %s32_s19 = int_to_ptr.vmem [resolvable:$true] %s31_s19  ;;  %s666_s21 = int_to_ptr.vmem [resolvable:$true] %s19_s21 }
   0x5   :  { %s511_s24 = scalar_lea.hbm %s768_s1, 256 }
   0x6   :  { %p512_p0 = scmp.ne.s32.totalorder %s768_s1, %s511_s24  ;;  %p515_p1 = scmp.lt.u32.totalorder %s511_s24, %s768_s1 }
   0x8   :  { %p517_p2 = pnand %p515_p1, %p512_p0 }
   0xa   :  { %520 = shalt.err (!%p517_p2)
}
   0xb   :  { %s521_s29 = scalar_lea.vmem %s32_s19, 256  ;;  %p526_p4 = scmp.lt.s32.totalorder %s32_s19, %s32_s19 }
   0xc   :  { %p522_p3 = scmp.ne.s32.totalorder %s32_s19, %s521_s29  ;;  %p527_p5 = scmp.lt.s32.totalorder %s521_s29, %s521_s29 }
   0xe   :  { %p528_p6 = por %p527_p5, %p526_p4 }
  0x10   :  { %p529_p7 = pnand %p528_p6, %p522_p3 }
  0x12   :  { %532 = shalt.err (!%p529_p7)
}
  0x13   :  { %s631_s30 = smov 128   ;;  %s632_s6 = smov 8  }
  0x14   :  { %37 = dma.hbm_to_vmem [thread:$0]  %s768_s1, 256, %s32_s19, [#allocation6], %s631_s30, %s631_s30, %s632_s6  }
  0x15   :  { %s533_s11 = scalar_lea.hbm %s767_s0, 256 }
  0x16   :  { %p534_p8 = scmp.ne.s32.totalorder %s767_s0, %s533_s11  ;;  %p537_p9 = scmp.lt.u32.totalorder %s533_s11, %s767_s0 }
  0x18   :  { %p539_p10 = pnand %p537_p9, %p534_p8 }
  0x1a   :  { %542 = shalt.err (!%p539_p10)
}
  0x1b   :  { %s543_s16 = scalar_lea.vmem %s666_s21, 256  ;;  %p548_p12 = scmp.lt.s32.totalorder %s666_s21, %s666_s21 }
  0x1c   :  { %p544_p11 = scmp.ne.s32.totalorder %s666_s21, %s543_s16  ;;  %p549_p13 = scmp.lt.s32.totalorder %s543_s16, %s543_s16 }
  0x1e   :  { %p550_p0 = por %p549_p13, %p548_p12 }
  0x20   :  { %p551_p1 = pnand %p550_p0, %p544_p11 }
  0x22   :  { %554 = shalt.err (!%p551_p1)
}
  0x23   :  { %25 = dma.hbm_to_vmem [thread:$0]  %s767_s0, 256, %s666_s21, [#allocation3], %s631_s30, %s631_s30, %s632_s6  }
  0x24   :  { %s633_s18 = smov [#allocation7]   ;;  %s634_s20 = smov [#allocation8]  }
  0x25   :  { %s43_s19 = sshll.u32 %s633_s18, 4  ;;  %s55_s22 = sshll.u32 %s634_s20, 4  ;;  %s44_s19 = int_to_ptr.vmem [resolvable:$true] %s43_s19  ;;  %s703_s22 = int_to_ptr.vmem [resolvable:$true] %s55_s22 }
  0x26   :  { %s555_s25 = scalar_lea.hbm %s769_s2, 2048 }
  0x27   :  { %p556_p2 = scmp.ne.s32.totalorder %s769_s2, %s555_s25  ;;  %p559_p3 = scmp.lt.u32.totalorder %s555_s25, %s769_s2 }
  0x29   :  { %p561_p4 = pnand %p559_p3, %p556_p2 }
  0x2b   :  { %564 = shalt.err (!%p561_p4)
}
  0x2c   :  { %s565_s0 = scalar_lea.vmem %s44_s19, 2048  ;;  %p570_p6 = scmp.lt.s32.totalorder %s44_s19, %s44_s19 }
  0x2d   :  { %p566_p5 = scmp.ne.s32.totalorder %s44_s19, %s565_s0  ;;  %p571_p7 = scmp.lt.s32.totalorder %s565_s0, %s565_s0 }
  0x2f   :  { %p572_p8 = por %p571_p7, %p570_p6 }
  0x31   :  { %p573_p9 = pnand %p572_p8, %p566_p5 }
  0x33   :  { %576 = shalt.err (!%p573_p9)
}
  0x34   :  { %49 = dma.hbm_to_vmem [thread:$0]  %s769_s2, 2048, %s44_s19, [#allocation6], %s631_s30, %s631_s30, %s632_s6  }
  0x35   :  { %s577_s10 = scalar_lea.hbm %s770_s3, 2048 }
  0x36   :  { %p578_p10 = scmp.ne.s32.totalorder %s770_s3, %s577_s10  ;;  %p581_p11 = scmp.lt.u32.totalorder %s577_s10, %s770_s3 }
  0x38   :  { %p583_p12 = pnand %p581_p11, %p578_p10 }
  0x3a   :  { %586 = shalt.err (!%p583_p12)
}
  0x3b   :  { %s587_s15 = scalar_lea.vmem %s703_s22, 2048  ;;  %p592_p0 = scmp.lt.s32.totalorder %s703_s22, %s703_s22 }
  0x3c   :  { %p588_p13 = scmp.ne.s32.totalorder %s703_s22, %s587_s15  ;;  %p593_p1 = scmp.lt.s32.totalorder %s587_s15, %s587_s15 }
  0x3e   :  { %p594_p2 = por %p593_p1, %p592_p0 }
  0x40   :  { %p595_p3 = pnand %p594_p2, %p588_p13 }
  0x42   :  { %598 = shalt.err (!%p595_p3)
}
  0x43   :  { %61 = dma.hbm_to_vmem [thread:$0]  %s770_s3, 2048, %s703_s22, [#allocation9], %s631_s30, %s631_s30, %s632_s6  }
  0x44   :  { %621 = dma.done.wait [#allocation3], 256  }
  0x45   :  { %622 = vsyncadd [#allocation3], 4294967040 }
  0x46   :  { %623 = dma.done.wait [#allocation6], 2304  }
  0x47   :  { %624 = vsyncadd [#allocation6], 4294964992 }
  0x48   :  { %625 = dma.done.wait [#allocation9], 2048  }
  0x49   :  { %626 = vsyncadd [#allocation9], 4294965248  ;;  %v96_v0 = vld [vmem:[#allocation8] sm:$0xff]  ;;  %v97_v1 = vld [vmem:[#allocation8 + $0x8] sm:$0xff] }
  0x4a   :  { %v80_v2 = vld [vmem:[#allocation7] sm:$0xff]  ;;  %v430_v3 = vpack.c.bf16 %v97_v1, %v96_v0  ;;  %v81_v4 = vld [vmem:[#allocation7 + $0x8] sm:$0xff]  ;;  %v98_v5 = vld [vmem:[#allocation8 + $0x10] sm:$0xff] }
  0x4b   :  { %v99_v6 = vld [vmem:[#allocation8 + $0x18] sm:$0xff]  ;;  %v462_v7 = vpack.c.bf16 %v81_v4, %v80_v2  ;;  %v82_v9 = vld [vmem:[#allocation7 + $0x10] sm:$0xff]  ;;  %v100_v11 = vld [vmem:[#allocation8 + $0x20] sm:$0xff] }
  0x4c   :  { %v434_v8 = vpack.c.bf16 %v99_v6, %v98_v5  ;;  %v83_v10 = vld [vmem:[#allocation7 + $0x18] sm:$0xff]  ;;  %431 = vmatprep.subr.bf16.mxu1 %v430_v3  ;;  %v101_v13 = vld [vmem:[#allocation8 + $0x28] sm:$0xff]  ;;  %v84_v14 = vld [vmem:[#allocation7 + $0x20] sm:$0xff] }
  0x4d   :  { %v466_v12 = vpack.c.bf16 %v83_v10, %v82_v9  ;;  %v85_v15 = vld [vmem:[#allocation7 + $0x28] sm:$0xff]  ;;  %463 = vmatprep.subr.bf16.mxu0 %v462_v7  ;;  %433 = vmatpush3.bf16.msra.mxu1 %v430_v3  ;;  %v438_v16 = vpack.c.bf16 %v101_v13, %v100_v11  ;;  %v102_v18 = vld [vmem:[#allocation8 + $0x30] sm:$0xff]  ;;  %v103_v19 = vld [vmem:[#allocation8 + $0x38] sm:$0xff] }
  0x4e   :  { %465 = vmatpush3.bf16.msra.mxu0 %v462_v7  ;;  %435 = vmatprep.subr.bf16.mxu1 %v434_v8  ;;  %v470_v17 = vpack.c.bf16 %v85_v15, %v84_v14  ;;  %v86_v20 = vld [vmem:[#allocation7 + $0x30] sm:$0xff]  ;;  %v87_v21 = vld [vmem:[#allocation7 + $0x38] sm:$0xff]  ;;  %v442_v22 = vpack.c.bf16 %v103_v19, %v102_v18  ;;  %v104_v24 = vld [vmem:[#allocation8 + $0x40] sm:$0xff] }
  0x4f   :  { %467 = vmatprep.subr.bf16.mxu0 %v466_v12  ;;  %v474_v23 = vpack.c.bf16 %v87_v21, %v86_v20  ;;  %v105_v25 = vld [vmem:[#allocation8 + $0x48] sm:$0xff]  ;;  %v740_v26 = vld [vmem:[#allocation5] sm:$0xff]  ;;  %v88_v27 = vld [vmem:[#allocation7 + $0x40] sm:$0xff] }
  0x50   :  { %v89_v28 = vld [vmem:[#allocation7 + $0x48] sm:$0xff]  ;;  %392 = vmatprep.mubr.f32.mxu1 %v740_v26  ;;  %v743_v29 = vld [vmem:[#allocation2] sm:$0xff]  ;;  %v446_v30 = vpack.c.bf16 %v105_v25, %v104_v24  ;;  %v106_v32 = vld [vmem:[#allocation8 + $0x50] sm:$0xff] }
  0x51   :  { %437 = vmatpush3.bf16.msra.mxu1 %v434_v8  ;;  %427 = vmatprep.mubr.f32.mxu0 %v743_v29  ;;  %v478_v31 = vpack.c.bf16 %v89_v28, %v88_v27  ;;  %v107_v33 = vld [vmem:[#allocation8 + $0x58] sm:$0xff]  ;;  %v90_v34 = vld [vmem:[#allocation7 + $0x50] sm:$0xff]  ;;  %v108_v38 = vld [vmem:[#allocation8 + $0x60] sm:$0xff]  ;;  %v292_v4 = vsub.f32 %v743_v29, %v740_v26 }
  0x52   :  { %469 = vmatpush3.bf16.msra.mxu0 %v466_v12  ;;  %439 = vmatprep.subr.bf16.mxu1 %v438_v16  ;;  %v91_v35 = vld [vmem:[#allocation7 + $0x58] sm:$0xff]  ;;  %v450_v36 = vpack.c.bf16 %v107_v33, %v106_v32  ;;  %v109_v39 = vld [vmem:[#allocation8 + $0x68] sm:$0xff]  ;;  %v92_v40 = vld [vmem:[#allocation7 + $0x60] sm:$0xff] }
  0x53   :  { %471 = vmatprep.subr.bf16.mxu0 %v470_v17  ;;  %v482_v37 = vpack.c.bf16 %v91_v35, %v90_v34  ;;  %v93_v41 = vld [vmem:[#allocation7 + $0x68] sm:$0xff]  ;;  %v454_v42 = vpack.c.bf16 %v109_v39, %v108_v38  ;;  %v110_v44 = vld [vmem:[#allocation8 + $0x70] sm:$0xff]  ;;  %v111_v45 = vld [vmem:[#allocation8 + $0x78] sm:$0xff] }
  0x54   :  { %v486_v43 = vpack.c.bf16 %v93_v41, %v92_v40  ;;  %v94_v46 = vld [vmem:[#allocation7 + $0x70] sm:$0xff]  ;;  %v95_v47 = vld [vmem:[#allocation7 + $0x78] sm:$0xff]  ;;  %v458_v48 = vpack.c.bf16 %v111_v45, %v110_v44  ;;  %v77_v51 = vld [vmem:[#allocation2 + $0x8] sm:$0xff] }
  0x55   :  { %441 = vmatpush3.bf16.msra.mxu1 %v438_v16  ;;  %v490_v49 = vpack.c.bf16 %v95_v47, %v94_v46  ;;  %v79_v50 = vld [vmem:[#allocation5 + $0x8] sm:$0xff]  ;;  %v321_v54 = vld [vmem:[%s771_s4] ss:$0 sm:$0xff]  ;;  %s635_s4 = smov [#allocation10]  }
  0x56   :  { %473 = vmatpush3.bf16.msra.mxu0 %v470_v17  ;;  %443 = vmatprep.subr.bf16.mxu1 %v442_v22  ;;  %v293_v3 = vsub.f32 %v77_v51, %v79_v50  ;;  %s305_s17 = sshll.u32 %s635_s4, 4  ;;  %s306_s17 = int_to_ptr.vmem [resolvable:$true] %s305_s17 }
  0x57   :  { %475 = vmatprep.subr.bf16.mxu0 %v474_v23  ;;  %s599_s18 = scalar_lea.vmem %s306_s17, 256  ;;  %p604_p5 = scmp.lt.s32.totalorder %s306_s17, %s306_s17 }
  0x58   :  { %p600_p4 = scmp.ne.s32.totalorder %s306_s17, %s599_s18  ;;  %p605_p6 = scmp.lt.s32.totalorder %s599_s18, %s599_s18 }
  0x59   :  { %445 = vmatpush3.bf16.msra.mxu1 %v442_v22 }
  0x5a   :  { %477 = vmatpush3.bf16.msra.mxu0 %v474_v23  ;;  %447 = vmatprep.subr.bf16.mxu1 %v446_v30  ;;  %p606_p7 = por %p605_p6, %p604_p5 }
  0x5b   :  { %479 = vmatprep.subr.bf16.mxu0 %v478_v31 }
  0x5c   :  { %p607_p8 = pnand %p606_p7, %p600_p4 }
  0x5d   :  { %449 = vmatpush3.bf16.msra.mxu1 %v446_v30 }
  0x5e   :  { %481 = vmatpush3.bf16.msra.mxu0 %v478_v31  ;;  %451 = vmatprep.subr.bf16.mxu1 %v450_v36 }
  0x5f   :  { %483 = vmatprep.subr.bf16.mxu0 %v482_v37 }
  0x61   :  { %453 = vmatpush3.bf16.msra.mxu1 %v450_v36 }
  0x62   :  { %485 = vmatpush3.bf16.msra.mxu0 %v482_v37  ;;  %455 = vmatprep.subr.bf16.mxu1 %v454_v42 }
  0x63   :  { %487 = vmatprep.subr.bf16.mxu0 %v486_v43 }
  0x65   :  { %457 = vmatpush3.bf16.msra.mxu1 %v454_v42 }
  0x66   :  { %489 = vmatpush3.bf16.msra.mxu0 %v486_v43  ;;  %459 = vmatprep.subr.bf16.mxu1 %v458_v48 }
  0x67   :  { %491 = vmatprep.subr.bf16.mxu0 %v490_v49 }
  0x69   :  { %461 = vmatpush3.bf16.msra.mxu1 %v458_v48 }
  0x6a   :  { %493 = vmatpush3.bf16.msra.mxu0 %v490_v49 }
  0x6c   :  { %393 = vmatmul.mubr.f32.vlgmr.msra.gmra.mrb[0].mxu1 %v79_v50 }
  0x6d   :  { %428 = vmatmul.mubr.f32.vlgmr.msra.gmra.mrb[0].mxu0 %v77_v51 }
 0x13f   :  { %v394_v52 = vpop.f32.mrb[0].mxu1 }
 0x140   :  { %v429_v53 = vpop.f32.mrb[0].mxu0  ;;  %v178_v55 = vpop.f32.mrb[1].mxu1 }
 0x141   :  { %v259_v56 = vadd.f32 %v429_v53, %v394_v52  ;;  %v253_v57 = vpop.f32.mrb[1].mxu0 }
 0x142   :  { %v254_v58 = vadd.f32 %v253_v57, %v178_v55 }
 0x143   :  { %v270_v59 = vadd.f32 %v321_v54, %v259_v56 }
 0x144   :  { %v269_v60 = vadd.f32 %v321_v54, %v254_v58 }
 0x145   :  { %v323_v61 = vmul.f32 -1.442695, %v270_v59 }
 0x146   :  { %v322_v62 = vmul.f32 -1.442695, %v269_v60 }
 0x147   :  { %503 = vpow2.f32 %v323_v61 }
 0x148   :  { %505 = vpow2.f32 %v322_v62 }
 0x151   :  { %v504_v63 = vpop.eup %503 }
 0x152   :  { %v506_v0 = vpop.eup %505  ;;  %v278_v1 = vadd.f32 1.0, %v504_v63 }
 0x153   :  { %v277_v2 = vadd.f32 1.0, %v506_v0 }
 0x154   :  { %507 = vrcp.f32 %v278_v1 }
 0x155   :  { %509 = vrcp.f32 %v277_v2 }
 0x15e   :  { %v508_v5 = vpop.eup %507 }
 0x15f   :  { %v510_v6 = vpop.eup %509  ;;  %v295_v7 = vmul.f32 %v508_v5, %v293_v3 }
 0x160   :  { %v294_v8 = vmul.f32 %v510_v6, %v292_v4 }
 0x161   :  { %v297_v9 = vadd.f32 %v295_v7, %v79_v50 }
 0x162   :  { %v296_v10 = vadd.f32 %v294_v8, %v740_v26 }
 0x163   :  { %299 = vst [vmem:[#allocation10 + $0x8] sm:$0xff] %v297_v9 }
 0x164   :  { %298 = vst [vmem:[#allocation10] sm:$0xff] %v296_v10 }
 0x165   :  { %610 = shalt.err (!%p607_p8)
}
 0x166   :  { %s611_s22 = scalar_lea.hbm %s772_s5, 256 }
 0x167   :  { %p612_p9 = scmp.ne.s32.totalorder %s772_s5, %s611_s22  ;;  %p615_p10 = scmp.lt.u32.totalorder %s611_s22, %s772_s5 }
 0x169   :  { %p617_p11 = pnand %p615_p10, %p612_p9 }
 0x16b   :  { %620 = shalt.err (!%p617_p11)
}
 0x16c   :  { %311 = dma.vmem_to_hbm [thread:$0]  %s306_s17, 256, %s772_s5, [#allocation4], %s631_s30, %s631_s30, %s632_s6  }
 0x16d   :  { %627 = dma.done.wait [#allocation4], 256  }
 0x16e   :  { %628 = vsyncadd [#allocation4], 4294967040 }
 0x16f   :  { %315 = vsyncpa [#allocation3], 1 }
 0x170   :  { %316 = vsyncpa [#allocation6], 1 }
 0x171   :  { %317 = vsyncpa [#allocation9], 1 }
 0x172   :  { %318 = vsyncpa [#allocation4], 1 }

</bundles_post_ra>
